<compile_context>
chip_gen: v5e
topology: v5e:2x2
jax: 0.10.0
libtpu: 0.0.40
codegen_flags: <defaults>
</compile_context>

<pallas_src>
import jax
import jax.numpy as jnp
from jax.experimental import pallas as pl
from jax.experimental.pallas import tpu as pltpu


_NUM_CORE_SPLITS = 2          # outer "parallel" grid axis (2 TCs on v7x)
_MAX_TILE_D = 2048            # cap per-tile lane width
_VMEM_TILE_BUDGET = 20 << 20  # 3 inputs x 2 pipeline buffers must stay under this


def _round_up(x, m):
    return ((x + m - 1) // m) * m


def _l1ws_kernel(out_ref, cov_ref, inp_ref,      # inputs  (N, TD) tiles
                 l1_out_ref, bh_out_ref,         # outputs (1,1,1) / (1,N,1) per split
                 l1_acc, bh_acc):                # VMEM scratch accumulators
    ki = pl.program_id(1)

    @pl.when(ki == 0)
    def _init():
        l1_acc[...] = jnp.zeros_like(l1_acc)
        bh_acc[...] = jnp.zeros_like(bh_acc)

    # Native-dtype tiles are DMA'd in; cast to f32 on the VPU.
    o = out_ref[...].astype(jnp.float32)          # (N, TD)
    c = cov_ref[...].astype(jnp.float32)          # (N, TD)
    x = inp_ref[...].astype(jnp.float32)          # (N, TD)

    # ---- L1 partial: sum |covers - outputs| over this tile ----
    l1_acc[...] += jnp.sum(jnp.abs(c - o), axis=(0, 1), keepdims=True)     # (1, 1)

    # ---- WS partial: per-row sums of (x255 - x_bar) * (x255 - o255) ----
    x255 = x * 255.0
    # round-half-to-even -> int32 -> flip LSB -> float (matches torch.round().int() ^ 1)
    x_bar = (jnp.round(x255).astype(jnp.int32) ^ 1).astype(jnp.float32)
    diff = 255.0 * (x - o)                        # == x255 - o255 (one less vmul/temp)
    bh_acc[...] += jnp.sum((x255 - x_bar) * diff, axis=1, keepdims=True)   # (N, 1)

    # Zero-padded columns contribute exactly 0 to both partials:
    #   |0-0| = 0  and  (0 - 1) * 255*(0 - 0) = 0.

    @pl.when(ki == pl.num_programs(1) - 1)
    def _finalize():
        l1_out_ref[...] = l1_acc[...].reshape(l1_out_ref.shape)
        bh_out_ref[...] = bh_acc[...].reshape(bh_out_ref.shape)


def l1ws_loss(outputs, targets, inputs):
    """Pallas-backed L1WSLoss. outputs/inputs/covers: (N,C,H,W); alphas: (N,)."""
    covers, alphas = targets
    n = outputs.shape[0]
    d = int(outputs.size // n)

    # Free view for contiguous NCHW; keep NATIVE dtype (cast happens in-kernel),
    # so bf16 models DMA half the HBM bytes of an fp32 pre-cast.
    out2 = outputs.reshape(n, d)
    cov2 = covers.reshape(n, d)
    inp2 = inputs.reshape(n, d)

    itemsize = max(out2.dtype.itemsize, cov2.dtype.itemsize, inp2.dtype.itemsize)

    # --- tile size along D (multiple of 128, VMEM-budgeted for v7x's 64 MiB) ---
    td_cap = max(128, (_VMEM_TILE_BUDGET // (6 * n * itemsize)) // 128 * 128)
    td = min(td_cap, _MAX_TILE_D)
    # keep a handful of tiles even for small D so the DMA pipeline has work
    td = min(td, max(128, _round_up(pl.cdiv(d, 4), 128)))

    p = _NUM_CORE_SPLITS
    kt = pl.cdiv(pl.cdiv(d, td), p)    # reduction tiles per core-split
    d_full = p * kt * td

    if d_full != d:
        pad = ((0, 0), (0, d_full - d))
        out2 = jnp.pad(out2, pad)
        cov2 = jnp.pad(cov2, pad)
        inp2 = jnp.pad(inp2, pad)

    def d_map(pi, ki):
        return (0, pi * kt + ki)

    l1_part, bh_part = pl.pallas_call(
        _l1ws_kernel,
        out_shape=(
            jax.ShapeDtypeStruct((p, 1, 1), jnp.float32),
            jax.ShapeDtypeStruct((p, n, 1), jnp.float32),
        ),
        grid=(p, kt),
        in_specs=[
            pl.BlockSpec((n, td), d_map),
            pl.BlockSpec((n, td), d_map),
            pl.BlockSpec((n, td), d_map),
        ],
        out_specs=(
            pl.BlockSpec((1, 1, 1), lambda pi, ki: (pi, 0, 0)),
            pl.BlockSpec((1, n, 1), lambda pi, ki: (pi, 0, 0)),
        ),
        scratch_shapes=[
            pltpu.VMEM((1, 1), jnp.float32),   # L1 running sum
            pltpu.VMEM((n, 1), jnp.float32),   # per-row betas_hat running sums
        ],
        compiler_params=pltpu.CompilerParams(
            dimension_semantics=("parallel", "arbitrary"),
            vmem_limit_bytes=32 * 1024 * 1024,
        ),
        cost_estimate=pl.CostEstimate(
            flops=int(8 * n * d),
            transcendentals=0,
            bytes_accessed=int(3 * n * d * itemsize + n * 4),
        ),
    )(out2, cov2, inp2)

    # --- tiny finalize in plain JAX (combine per-core partials) ---
    l1_sum = jnp.sum(l1_part)
    bh = jnp.maximum(jnp.sum(bh_part[:, :, 0], axis=0) / float(d), 0.0)   # (N,)
    betas = (alphas / 2.0).astype(jnp.float32)
    ws_mae = jnp.mean(jnp.abs(bh - betas))
    return l1_sum / float(n * d) + ws_mae


def _l1ws_ref(outputs, targets, inputs):
    """Pure-JAX reference mirroring the PyTorch module (for verification)."""
    covers, alphas = targets
    l1 = jnp.mean(jnp.abs(covers - outputs))
    betas = alphas / 2.0
    x = inputs * 255.0
    o = outputs * 255.0
    x_bar = (jnp.round(x).astype(jnp.int32) ^ 1).astype(jnp.float32)
    d = inputs.size // inputs.shape[0]
    bh = jnp.sum((x - x_bar) * (x - o), axis=(1, 2, 3)) / float(d)
    bh = jnp.maximum(bh, 0.0)
    return l1 + jnp.mean(jnp.abs(bh - betas))


if __name__ == "__main__":
    key = jax.random.PRNGKey(0)
    k1, k2, k3, k4 = jax.random.split(key, 4)

    N, C, H, W = 2, 4, 16, 16
    outputs = jax.random.uniform(k1, (N, C, H, W), dtype=jnp.float32)
    covers = jax.random.uniform(k2, (N, C, H, W), dtype=jnp.float32)
    inputs = jax.random.uniform(k3, (N, C, H, W), dtype=jnp.float32)
    alphas = jax.random.uniform(k4, (N,), dtype=jnp.float32) * 10.0
    targets = (covers, alphas)

    loss = jax.block_until_ready(l1ws_loss(outputs, targets, inputs))
    ref = jax.block_until_ready(_l1ws_ref(outputs, targets, inputs))
    assert jnp.allclose(loss, ref, rtol=1e-4, atol=1e-4), (loss, ref)

    print("KERNEL_OK")
</pallas_src>

<mosaic_0001>
module attributes {stable_mosaic.version = 11 : i64} {
  func.func @_l1ws_kernel(%arg0: i32, %arg1: i32, %arg2: memref<2x256xf32, #tpu.memory_space<vmem>>, %arg3: memref<2x256xf32, #tpu.memory_space<vmem>>, %arg4: memref<2x256xf32, #tpu.memory_space<vmem>>, %arg5: memref<1x1x1xf32, #tpu.memory_space<vmem>>, %arg6: memref<1x2x1xf32, #tpu.memory_space<vmem>>, %arg7: memref<1x1xf32, #tpu.memory_space<vmem>>, %arg8: memref<2x1xf32, #tpu.memory_space<vmem>>) attributes {dimension_semantics = [#tpu.dimension_semantics<parallel>, #tpu.dimension_semantics<arbitrary>], iteration_bounds = array<i64: 2, 2>, scalar_prefetch = 0 : i64, scratch_operands = 2 : i64, tpu.core_type = #tpu.core_type<tc>, window_params = [{transform_indices = @transform_0, window_bounds = array<i64: 2, 256>}, {transform_indices = @transform_1, window_bounds = array<i64: 2, 256>}, {transform_indices = @transform_2, window_bounds = array<i64: 2, 256>}, {transform_indices = @transform_3, window_bounds = array<i64: 1, 1, 1>}, {transform_indices = @transform_4, window_bounds = array<i64: 1, 2, 1>}]} {
    %c0_i32 = arith.constant 0 : i32
    %0 = arith.cmpi eq, %arg1, %c0_i32 : i32
    %1 = arith.extui %0 : i1 to i32
    %c0_i32_0 = arith.constant 0 : i32
    %2 = arith.cmpi ne, %1, %c0_i32_0 : i32
    scf.if %2 {
      %cst_19 = arith.constant 0.000000e+00 : f32
      %36 = vector.broadcast %cst_19 : f32 to vector<1x1xf32>
      %c0_20 = arith.constant 0 : index
      %c0_21 = arith.constant 0 : index
      %37 = vector.load %arg7[%c0_20, %c0_21] : memref<1x1xf32, #tpu.memory_space<vmem>>, vector<1x1xf32>
      tpu.vector_store %arg7[%c0_20, %c0_21], %36 {strides = array<i32>} : memref<1x1xf32, #tpu.memory_space<vmem>>, vector<1x1xf32>,
      %cst_22 = arith.constant 0.000000e+00 : f32
      %38 = vector.broadcast %cst_22 : f32 to vector<2x1xf32>
      %c0_23 = arith.constant 0 : index
      %c0_24 = arith.constant 0 : index
      %39 = vector.load %arg8[%c0_23, %c0_24] : memref<2x1xf32, #tpu.memory_space<vmem>>, vector<2x1xf32>
      tpu.vector_store %arg8[%c0_23, %c0_24], %38 {strides = array<i32>} : memref<2x1xf32, #tpu.memory_space<vmem>>, vector<2x1xf32>,
    } else {
    }
    %c0 = arith.constant 0 : index
    %c0_1 = arith.constant 0 : index
    %3 = vector.load %arg2[%c0, %c0_1] : memref<2x256xf32, #tpu.memory_space<vmem>>, vector<2x256xf32>
    %c0_2 = arith.constant 0 : index
    %c0_3 = arith.constant 0 : index
    %4 = vector.load %arg3[%c0_2, %c0_3] : memref<2x256xf32, #tpu.memory_space<vmem>>, vector<2x256xf32>
    %c0_4 = arith.constant 0 : index
    %c0_5 = arith.constant 0 : index
    %5 = vector.load %arg4[%c0_4, %c0_5] : memref<2x256xf32, #tpu.memory_space<vmem>>, vector<2x256xf32>
    %c0_6 = arith.constant 0 : index
    %c0_7 = arith.constant 0 : index
    %6 = vector.load %arg7[%c0_6, %c0_7] : memref<1x1xf32, #tpu.memory_space<vmem>>, vector<1x1xf32>
    %7 = arith.subf %4, %3 : vector<2x256xf32>
    %8 = math.absf %7 : vector<2x256xf32>
    %9 = vector.shape_cast %8 : vector<2x256xf32> to vector<1x2x256xf32>
    %cst = arith.constant dense<0.000000e+00> : vector<1xf32>
    %10 = vector.multi_reduction <add>, %9, %cst [1, 2] : vector<1x2x256xf32> to vector<1xf32>
    %11 = vector.shape_cast %10 : vector<1xf32> to vector<1x1x1xf32>
    %12 = vector.extract %11[0, 0, 0] : f32 from vector<1x1x1xf32>
    %13 = vector.broadcast %12 : f32 to vector<1x1xf32>
    %14 = arith.addf %6, %13 : vector<1x1xf32>
    %c0_8 = arith.constant 0 : index
    %c0_9 = arith.constant 0 : index
    %15 = vector.load %arg7[%c0_8, %c0_9] : memref<1x1xf32, #tpu.memory_space<vmem>>, vector<1x1xf32>
    tpu.vector_store %arg7[%c0_8, %c0_9], %14 {strides = array<i32>} : memref<1x1xf32, #tpu.memory_space<vmem>>, vector<1x1xf32>,
    %cst_10 = arith.constant 2.550000e+02 : f32
    %16 = vector.broadcast %cst_10 : f32 to vector<2x256xf32>
    %17 = arith.mulf %5, %16 : vector<2x256xf32>
    %18 = math.roundeven %17 : vector<2x256xf32>
    %19 = arith.fptosi %18 : vector<2x256xf32> to vector<2x256xi32>
    %c1_i32 = arith.constant 1 : i32
    %20 = vector.broadcast %c1_i32 : i32 to vector<2x256xi32>
    %21 = arith.xori %19, %20 : vector<2x256xi32>
    %22 = arith.sitofp %21 : vector<2x256xi32> to vector<2x256xf32>
    %23 = arith.subf %5, %3 : vector<2x256xf32>
    %cst_11 = arith.constant 2.550000e+02 : f32
    %24 = vector.broadcast %cst_11 : f32 to vector<2x256xf32>
    %25 = arith.mulf %24, %23 : vector<2x256xf32>
    %c0_12 = arith.constant 0 : index
    %c0_13 = arith.constant 0 : index
    %26 = vector.load %arg8[%c0_12, %c0_13] : memref<2x1xf32, #tpu.memory_space<vmem>>, vector<2x1xf32>
    %27 = arith.subf %17, %22 : vector<2x256xf32>
    %28 = arith.mulf %27, %25 : vector<2x256xf32>
    %cst_14 = arith.constant dense<0.000000e+00> : vector<2xf32>
    %29 = vector.multi_reduction <add>, %28, %cst_14 [1] : vector<2x256xf32> to vector<2xf32>
    %30 = vector.shape_cast %29 : vector<2xf32> to vector<2x1xf32>
    %31 = arith.addf %26, %30 : vector<2x1xf32>
    %c0_15 = arith.constant 0 : index
    %c0_16 = arith.constant 0 : index
    %32 = vector.load %arg8[%c0_15, %c0_16] : memref<2x1xf32, #tpu.memory_space<vmem>>, vector<2x1xf32>
    tpu.vector_store %arg8[%c0_15, %c0_16], %31 {strides = array<i32>} : memref<2x1xf32, #tpu.memory_space<vmem>>, vector<2x1xf32>,
    %c1_i32_17 = arith.constant 1 : i32
    %33 = arith.cmpi eq, %arg1, %c1_i32_17 : i32
    %34 = arith.extui %33 : i1 to i32
    %c0_i32_18 = arith.constant 0 : i32
    %35 = arith.cmpi ne, %34, %c0_i32_18 : i32
    scf.if %35 {
      %c0_19 = arith.constant 0 : index
      %c0_20 = arith.constant 0 : index
      %36 = vector.load %arg7[%c0_19, %c0_20] : memref<1x1xf32, #tpu.memory_space<vmem>>, vector<1x1xf32>
      %37 = vector.shape_cast %36 : vector<1x1xf32> to vector<1x1x1xf32>
      %c0_21 = arith.constant 0 : index
      %c0_22 = arith.constant 0 : index
      %c0_23 = arith.constant 0 : index
      %38 = vector.load %arg5[%c0_21, %c0_22, %c0_23] : memref<1x1x1xf32, #tpu.memory_space<vmem>>, vector<1x1x1xf32>
      tpu.vector_store %arg5[%c0_21, %c0_22, %c0_23], %37 {strides = array<i32>} : memref<1x1x1xf32, #tpu.memory_space<vmem>>, vector<1x1x1xf32>,
      %c0_24 = arith.constant 0 : index
      %c0_25 = arith.constant 0 : index
      %39 = vector.load %arg8[%c0_24, %c0_25] : memref<2x1xf32, #tpu.memory_space<vmem>>, vector<2x1xf32>
      %40 = vector.shape_cast %39 : vector<2x1xf32> to vector<1x2x1xf32>
      %c0_26 = arith.constant 0 : index
      %c0_27 = arith.constant 0 : index
      %c0_28 = arith.constant 0 : index
      %41 = vector.load %arg6[%c0_26, %c0_27, %c0_28] : memref<1x2x1xf32, #tpu.memory_space<vmem>>, vector<1x2x1xf32>
      tpu.vector_store %arg6[%c0_26, %c0_27, %c0_28], %40 {strides = array<i32>} : memref<1x2x1xf32, #tpu.memory_space<vmem>>, vector<1x2x1xf32>,
    } else {
    }
    return
  }
  func.func @transform_0(%arg0: i32, %arg1: i32) -> (i32, i32) {
    %c2_i32 = arith.constant 2 : i32
    %0 = arith.muli %arg0, %c2_i32 : i32
    %1 = arith.addi %0, %arg1 : i32
    %c0_i32 = arith.constant 0 : i32
    %c0_i32_0 = arith.constant 0 : i32
    return %c0_i32, %1 : i32, i32
  }
  func.func @transform_1(%arg0: i32, %arg1: i32) -> (i32, i32) {
    %c2_i32 = arith.constant 2 : i32
    %0 = arith.muli %arg0, %c2_i32 : i32
    %1 = arith.addi %0, %arg1 : i32
    %c0_i32 = arith.constant 0 : i32
    %c0_i32_0 = arith.constant 0 : i32
    return %c0_i32, %1 : i32, i32
  }
  func.func @transform_2(%arg0: i32, %arg1: i32) -> (i32, i32) {
    %c2_i32 = arith.constant 2 : i32
    %0 = arith.muli %arg0, %c2_i32 : i32
    %1 = arith.addi %0, %arg1 : i32
    %c0_i32 = arith.constant 0 : i32
    %c0_i32_0 = arith.constant 0 : i32
    return %c0_i32, %1 : i32, i32
  }
  func.func @transform_3(%arg0: i32, %arg1: i32) -> (i32, i32, i32) {
    %c0_i32 = arith.constant 0 : i32
    %c0_i32_0 = arith.constant 0 : i32
    %c0_i32_1 = arith.constant 0 : i32
    return %arg0, %c0_i32, %c0_i32_0 : i32, i32, i32
  }
  func.func @transform_4(%arg0: i32, %arg1: i32) -> (i32, i32, i32) {
    %c0_i32 = arith.constant 0 : i32
    %c0_i32_0 = arith.constant 0 : i32
    %c0_i32_1 = arith.constant 0 : i32
    return %arg0, %c0_i32, %c0_i32_0 : i32, i32, i32
  }
}

</mosaic_0001>

<bundles_post_ra>
// kernel: tpu_custom_call.1
= control target key start
LH: loop header
LB: loop body
LE: loop exit
PB: predicated region body
PF: predicated region fallthrough
CT: control target
= control target key end

     0   :  { %s1019_s0 = inlined_call_operand.hbm [shape: f32[2,1024], index: 0, kind: input, shape index: {}]   ;;  %s1020_s1 = inlined_call_operand.hbm [shape: f32[2,1024], index: 1, kind: input, shape index: {}]   ;;  %s1021_s2 = inlined_call_operand.hbm [shape: f32[2,1024], index: 2, kind: input, shape index: {}]   ;;  %s1022_s3 = inlined_call_operand.vmem [shape: f32[2,1,1], index: 3, kind: output, shape index: {0}]   ;;  %s1023_s4 = inlined_call_operand.vmem [shape: f32[2,2,1], index: 4, kind: output, shape index: {1}]  }
   0x1   :  { %1028 = sst [smem:[#allocation14_spill]] %s1020_s1 }
   0x2   :  { %10 = vsyncpa [#allocation5], 0 }
   0x3   :  { %12 = vsyncpa [#allocation5 + $0x1], 0 }
   0x4   :  { %13 = vsyncpa [#allocation7], 0 }
   0x5   :  { %15 = vsyncpa [#allocation7 + $0x1], 0  ;;  %s868_s15 = smov 0   ;;  %s870_s16 = smov 0  }
   0x6   :  { %s872_s17 = smov 0   ;;  %s874_s18 = smov 0  }
   0x7   :  { %s876_s19 = smov 0   ;;  %s878_s20 = smov 0  }
   0x8   :  { %s880_s21 = smov 0   ;;  %s882_s22 = smov 0  }
   0x9 LB: > { %1029 = sst [smem:[#allocation11_spill]] %s836_s21  ;;  %s1024_s23 = sadd.s32 4294967295, %s840_s22   ;;  %s840_s22 = sphi %s882_s22, %s21_s22   ;;  %s836_s21 = sphi %s880_s21, %s1039_s21   ;;  %s832_s20 = sphi %s878_s20, %s1044_s20   ;;  %s828_s19 = sphi %s876_s19, %s1037_s19   ;;  %s824_s18 = sphi %s874_s18, %s1043_s18   ;;  %s820_s17 = sphi %s872_s17, %s1042_s17   ;;  %s816_s16 = sphi %s870_s16, %s1041_s16   ;;  %s812_s15 = sphi %s868_s15, %s1040_s15  }
   0xa   : > { %s30_s24 = sadd.s32 1, %s832_s20  ;;  %s33_s25 = sadd.s32 1, %s836_s21 }
   0xb   : > { %p31_p0 = scmp.ge.s32.totalorder %s30_s24, 2  ;;  %s561_s26 = sshll.u32 %s836_s21, 1 }
   0xc   : > { %s44_s27 = sadd.s32 1, %s820_s17  ;;  %s38_s28 = sadd.s32 %s832_s20, %s561_s26 }
   0xd   : > { %s1046_s24 = smov (%p31_p0, %s30_s24), 0  ;;  %s1048_s25 = smov (!%p31_p0, %s33_s25), %s836_s21 }
   0xe   : > { %1030 = sst [smem:[#allocation12_spill]] %s1046_s24  ;;  %p51_p1 = scmp.ne.s32.totalorder %s820_s17, %s816_s16 }
   0xf   : > { %p35_p2 = scmp.ge.s32.totalorder %s1048_s25, 2  ;;  %p52_p3 = scmp.eq.s32.totalorder %s840_s22, 0 }
  0x10   : > { %p57_p4 = scmp.ne.s32.totalorder %s816_s16, %s812_s15  ;;  %p58_p5 = scmp.eq.s32.totalorder %s1024_s23, 0 }
  0x11   : > { %s1050_s25 = smov (%p35_p2, %s1048_s25), 0  ;;  %p53_p6 = por %p52_p3, %p51_p1 }
  0x12   : > { %1031 = sst [smem:[#allocation13_spill]] %s1050_s25  ;;  %p923_p7 = por %p58_p5, %p57_p4 }
  0x13   : > { %s562_s30 = sshll.u32 %s1050_s25, 1  ;;  %p614_p8 = scmp.lt.s32.totalorder %s840_s22, 4 }
  0x14   : > { %s40_s5 = sadd.s32 %s562_s30, %s1046_s24  ;;  %s193_s7 = sand.u32 1, %s820_s17  }
  0x15   : > { %s41_s6 = ssub.s32 %s38_s28, %s40_s5  ;;  %s569_s8 = sshll.u32 %s193_s7, 2 }
  0x16   : > { %p42_p9 = scmp.eq.s32.totalorder %s41_s6, 0  ;;  %s590_s9 = sshll.u32 %s38_s28, 2 }
  0x17   : > { %p931_p10 = pnand %p614_p8, %p53_p6  ;;  %s215_s12 = sand.u32 1, %s840_s22  }
  0x18   : > { %s936_s11 = scalar_select %p42_p9, %s820_s17, %s44_s27  }
  0x19   : > { %s1034_s1 = sld [smem:[#allocation14_spill]]  ;;  %s219_s26 = scalar_lea.vmem [#allocation6], %s569_s8 }
  0x1a   : > { %s230_s30 = sshll.u32 %s219_s26, 4  ;;  %p581_p11 = scmp.ge.s32.totalorder %s840_s22, 1  ;;  %s231_s30 = int_to_ptr.vmem [resolvable:$true] %s230_s30 }
  0x1b   : > { %s216_s28 = scalar_lea.sflag [#allocation7], %s215_s12  ;;  %p257_p12 = scmp.lt.s32.totalorder %s840_s22, 5 }
  0x1c   : > { %s204_s13 = scalar_lea.hbm %s1019_s0, %s590_s9  ;;  %s197_s14 = scalar_lea.vmem [#allocation4], %s569_s8 }
  0x1d   : > { %p946_p13 = pnand %p581_p11, %p257_p12  ;;  %s208_s26 = sshll.u32 %s197_s14, 4  ;;  %s209_s26 = int_to_ptr.vmem [resolvable:$true] %s208_s26 }
  0x1e   : > { %s241_s25 = scalar_lea.vmem [#allocation8], %s569_s8  ;;  %s263_s23 = sand.u32 (!%p946_p13), 1, %s816_s16  }
  0x1f   : > { %s226_s15 = scalar_lea.hbm %s1034_s1, %s590_s9  ;;  %s206_s1 = sshll.u32 %s204_s13, 4  ;;  %s207_s1 = int_to_ptr.hbm [resolvable:$true] %s206_s1 }
  0x20   : > { %s228_s5 = sshll.u32 %s226_s15, 4  ;;  %s194_s15 = scalar_lea.sflag [#allocation5], %s193_s7  ;;  %s229_s5 = int_to_ptr.hbm [resolvable:$true] %s228_s5 }
  0x21   : > { %610 = dma.hbm_to_vmem [thread:$0]  (!%p931_p10), %s229_s5, 64, %s231_s30, %s216_s28  }
  0x22   : > { %607 = dma.hbm_to_vmem [thread:$0]  (!%p931_p10), %s207_s1, 64, %s209_s26, %s194_s15  }
  0x23   : > { %s248_s5 = scalar_lea.hbm %s1021_s2, %s590_s9  ;;  %s252_s24 = sshll.u32 %s241_s25, 4  ;;  %s253_s24 = int_to_ptr.vmem [resolvable:$true] %s252_s24 }
  0x24   : > { %s250_s21 = sshll.u32 %s248_s5, 4  ;;  %261 = sbr.rel (%p946_p13) target bundleno = 264 (0x108), region = 32  ;;  %s251_s21 = int_to_ptr.hbm [resolvable:$true] %s250_s21 }
  0x25   : > { %613 = dma.hbm_to_vmem [thread:$0]  (!%p931_p10), %s251_s21, 64, %s253_s24, %s216_s28  }
  0x26   : > { %s582_s7 = sshll.u32 (!%p946_p13), %s263_s23, 2  ;;  %s264_s6 = scalar_lea.sflag (!%p946_p13), [#allocation5], %s263_s23 }
  0x27   : > { %s267_s1 = scalar_lea.vmem (!%p946_p13), [#allocation4], %s582_s7 }
  0x29   : > { %803 = dma.done.wait (%p923_p7), %s264_s6, 64  }
  0x2a   : > { %805 = vsyncadd (%p923_p7), %s264_s6, 4294967232  ;;  %s1036_s25 = sadd.s32 4294967295, %s840_s22   ;;  %s277_s21 = scalar_lea.vmem [#allocation6], %s582_s7 }
  0x2b   : > { %s273_s8 = sand.u32 1, %s1036_s25  }
  0x2c   : > { %s274_s9 = scalar_lea.sflag [#allocation7], %s273_s8 }
  0x2d   : > { %807 = dma.done.wait (%p923_p7), %s274_s9, 128  }
  0x2e   : > { %809 = vsyncadd (%p923_p7), %s274_s9, 4294967168  ;;  %p334_p0 = scmp.lt.s32.totalorder %s828_s19, 1  ;;  %s287_s15 = scalar_lea.vmem [#allocation8], %s582_s7 }
  0x2f   : > { %p586_p1 = scmp.ne.s32.totalorder %s824_s18, 0 }
  0x30   : > { %s1052_s19 = smov (!%p334_p0, %s828_s19), 1 }
  0x31   : > { %s336_s28 = scalar_lea.vmem %s1022_s3, %s1052_s19  ;;  %s585_s27 = sshll.u32 %s1052_s19, 1 }
  0x32   : > { %s985_s26 = scalar_lea.vmem %s1023_s4, %s585_s27  ;;  %344 = sbr.rel (%p586_p1) target bundleno = 58 (0x3a), region = 48 }
  0x37   : > { %vm345_vm0 = vcmask 0   ;;  %vm347_vm1 = vcmask 1024   ;;  %v842_v0 = vmov 0.0  }
  0x38   : > { %346 = vst.msk [vmem:[#allocation2] sm:$0x1] %vm345_vm0, %v842_v0 }
  0x39   : > { %348 = vst.msk [vmem:[#allocation3] sm:$0x3] %vm347_vm1, %v842_v0 }
  0x3a PF: > { %v349_v1 = vld [vmem:[%s267_s1] sm:$0xf]  ;;  %v350_v2 = vld [vmem:[%s277_s21] sm:$0xf]  ;;  %v351_v3 = vld [vmem:[%s287_s15] sm:$0xf] }
  0x3b   : > { %v353_v4 = vsub.f32 %v350_v2, %v349_v1  ;;  %v378_v5 = vmul.f32 255.0, %v351_v3  ;;  %v382_v8 = vsub.f32 %v351_v3, %v349_v1  ;;  %vm361_vm2 = vcmask 1041408   ;;  %p587_p2 = scmp.ne.s32.totalorder %s824_s18, 1 }
  0x3c   : > { %vm399_vm3 = vcmask 1024   ;;  %vm376_vm4 = vcmask 0  }
  0x3d   : > { %v354_v6 = vand.u32 2147483647, %v353_v4  ;;  %v597_v7 = vcvt.f32.s32 %v378_v5  ;;  %v383_v11 = vmul.f32 255.0, %v382_v8 }
  0x3f   : > { %356 = vst [vmem:[#allocation1] ss:$4 sm:$0xff] %v354_v6  ;;  %v380_v9 = vxor.u32 1, %v597_v7  ;;  %v352_v34 = vld [vmem:[#allocation2] sm:$0x1] }
  0x40   : > { %v384_v31 = vld [vmem:[#allocation3] sm:$0x3] }
  0x41   : > { %v381_v10 = vcvt.s32.f32 %v380_v9 }
  0x43   : > { %v385_v12 = vsub.f32 %v378_v5, %v381_v10 }
  0x45   : > { %v386_v13 = vmul.f32 %v385_v12, %v383_v11 }
  0x46   : > { %v357_v14 = vld.sshfl [vmem:[#allocation1] sm:$0xff pattern:$0x73625140]  ;;  %v358_v15 = vld.sshfl [vmem:[#allocation1 + $0x8] sm:$0xff pattern:$0x73625140] }
  0x47   : > { %v362_v16 = vsel %vm361_vm2, %v357_v14, 0.0  ;;  %v363_v17 = vsel %vm361_vm2, %v358_v15, 0.0  ;;  %388 = vst [vmem:[#allocation1] ss:$4 sm:$0xff] %v386_v13 }
  0x48   : > { %v364_v18 = vadd.f32 %v363_v17, %v362_v16 }
  0x4a   : > { %365 = vadd.xlane.f32.xlu0 %v364_v18 }
  0x4e   : > { %v389_v19 = vld.sshfl [vmem:[#allocation1] sm:$0xff pattern:$0x73625140]  ;;  %v390_v20 = vld.sshfl [vmem:[#allocation1 + $0x8] sm:$0xff pattern:$0x73625140] }
  0x4f   : > { %v393_v21 = vsel %vm361_vm2, %v389_v19, 0.0  ;;  %v394_v22 = vsel %vm361_vm2, %v390_v20, 0.0 }
  0x50   : > { %v395_v23 = vadd.f32 %v394_v22, %v393_v21 }
  0x52   : > { %396 = vadd.xlane.f32.xlu0 %v395_v23 }
  0xbd   : > { %v366_v24 = vpop.xlane.xlu0 %365 }
  0xbe   : > { %v367_v25 = vrot.slane %v366_v24, 4 }
  0xc0   : > { %v368_v26 = vadd.f32 %v367_v25, %v366_v24 }
  0xc2   : > { %v369_v27 = vrot.slane %v368_v26, 2 }
  0xc4   : > { %v370_v28 = vadd.f32 %v369_v27, %v368_v26 }
  0xc5   : > { %v397_v32 = vpop.xlane.xlu0 %396 }
  0xc6   : > { %v371_v29 = vrot.slane %v370_v28, 1  ;;  %v398_v33 = vadd.f32 %v397_v32, %v384_v31 }
  0xc8   : > { %v372_v30 = vadd.f32 %v371_v29, %v370_v28  ;;  %400 = vst.msk [vmem:[#allocation3] sm:$0x3] %vm399_vm3, %v398_v33 }
  0xca   : > { %593 = vpush %v372_v30 }
  0xfb   : > { %s594_s29 = spop %593  ;;  %404 = sbr.rel (%p587_p2) target bundleno = 264 (0x108), region = 52 }
  0xfc   : > { %v374_v35 = vstv %s594_s29 }
  0xfd   : > { %v375_v36 = vadd.f32 %v374_v35, %v352_v34 }
  0xff   : > { %377 = vst.msk [vmem:[#allocation2] sm:$0x1] %vm376_vm4, %v375_v36 }
 0x100   : > { %v407_v38 = vld [vmem:[#allocation3] sm:$0x3] }
 0x101   : > { %408 = vst.msk [vmem:[%s985_s26] sm:$0x3] %vm399_vm3, %v407_v38 }
 0x106   : > { %v405_v37 = vld [vmem:[#allocation2] sm:$0x1] }
 0x107   : > { %406 = vst.msk [vmem:[%s336_s28] sm:$0x1] %vm376_vm4, %v405_v37 }
 0x108 PF: > { %s21_s22 = sadd.s32 1, %s840_s22   ;;  %s1037_s19 = sld [smem:[#allocation11_spill]] }
 0x109   : > { %p18_p3 = scmp.ge.s32.totalorder %s21_s22, 6   ;;  %s1038_s5 = sld [smem:[#allocation12_spill]] }
 0x10a   : > { %s1039_s21 = sld [smem:[#allocation13_spill]]  ;;  %s1040_s15 = smov %s816_s16 }
 0x10b   : > { %s1041_s16 = smov %s820_s17  ;;  %s1042_s17 = smov %s936_s11 }
 0x10c   : > { %s1043_s18 = smov %s832_s20  ;;  %20 = sbr.rel (!%p18_p3) target bundleno = 9 (0x9), region = 116 }
 0x10f   : > { %s1044_s20 = smov %s1038_s5 }
 0x111   :  { %440 = vsyncpa [#allocation5], 1 }
 0x112   :  { %442 = vsyncpa [#allocation5 + $0x1], 1 }
 0x113   :  { %443 = vsyncpa [#allocation7], 1 }
 0x114   :  { %445 = vsyncpa [#allocation7 + $0x1], 1 }

</bundles_post_ra>
